<compile_context>
chip_gen: v7x
topology: tpu7x:2x2x1
jax: 0.10.0
libtpu: 0.0.40
codegen_flags: <defaults>
</compile_context>

<pallas_src>
import functools
import math

import jax
import jax.numpy as jnp
from jax.experimental import pallas as pl
from jax.experimental.pallas import tpu as pltpu


# ----------------------------------------------------------------------------
# In-kernel causal-conv tile
# ----------------------------------------------------------------------------
def _conv_tile(x_ref, w_ref, carry_ref, *, K, T, fused):
    """Causal conv of the current (n, l) tile. Returns (C_out, T) float32.

    x_ref:     (1, C_in, T)                      bf16 input tile of sequence n
    w_ref:     fused: (C_out, K*C_in) bf16, else (K, C_out, C_in) bf16
    carry_ref: (C_in, max(K-1, 1))               bf16 tail of previous tile
    """
    l = pl.program_id(1)
    x_tile = x_ref[0]                                     # (C_in, T) bf16

    if K > 1:
        # Causal zero pad == zero carry at the first L-tile of each sequence.
        @pl.when(l == 0)
        def _():
            carry_ref[...] = jnp.zeros_like(carry_ref)

        window = jnp.concatenate([carry_ref[...], x_tile], axis=-1)  # (C_in, T+K-1)
        # Tail of this tile becomes the halo of the next tile.
        carry_ref[...] = x_tile[:, T - (K - 1):]
    else:
        window = x_tile

    if fused:
        # One MXU contraction over K*C_in (best for small C_in).
        if K > 1:
            stacked = jnp.concatenate([window[:, k:k + T] for k in range(K)], axis=0)
        else:
            stacked = window
        y = jnp.dot(w_ref[...], stacked, preferred_element_type=jnp.float32)
    else:
        # Per-tap accumulating matmuls: avoids the (K*C_in, T) VMEM intermediate
        # (better for large C_in; accumulation rides the MXU result path).
        y = jnp.dot(w_ref[0], window[:, 0:T], preferred_element_type=jnp.float32)
        for k in range(1, K):
            y = y + jnp.dot(w_ref[k], window[:, k:k + T],
                            preferred_element_type=jnp.float32)
    return y                                              # (C_out, T) f32


# ----------------------------------------------------------------------------
# Pass 1: per-(n, channel) sum / sum-of-squares of the conv output
# ----------------------------------------------------------------------------
def _stats_kernel(x_ref, w_ref, stats_ref, carry_ref, acc_ref, *,
                  K, T, fused, L_valid):
    l = pl.program_id(1)
    num_l = pl.num_programs(1)

    y = _conv_tile(x_ref, w_ref, carry_ref, K=K, T=T, fused=fused)  # (C_out, T)

    if L_valid % T != 0:
        # Padded tail columns must not contribute to the batch statistics.
        col = l * T + jax.lax.broadcasted_iota(jnp.int32, (1, T), 1)
        y = jnp.where(col < L_valid, y, 0.0)

    s = jnp.sum(y, axis=1, keepdims=True)                 # (C_out, 1)
    sq = jnp.sum(y * y, axis=1, keepdims=True)            # (C_out, 1)
    tile_stats = jnp.concatenate([s, sq], axis=1)         # (C_out, 2)

    @pl.when(l == 0)
    def _():
        acc_ref[...] = jnp.zeros_like(acc_ref)
    acc_ref[...] += tile_stats

    # Single lane-sparse store per sequence instead of per L-step.
    @pl.when(l == num_l - 1)
    def _():
        stats_ref[...] = acc_ref[...][None]


# ----------------------------------------------------------------------------
# Pass 2: conv recompute (BN scale pre-folded into weights) + shift + ReLU
# ----------------------------------------------------------------------------
def _norm_kernel(x_ref, w_ref, shift_ref, o_ref, carry_ref, *, K, T, fused):
    y = _conv_tile(x_ref, w_ref, carry_ref, K=K, T=T, fused=fused)  # already scaled
    out = jnp.maximum(y + shift_ref[...], 0.0)
    o_ref[...] = out[None, :, :].astype(o_ref.dtype)      # lane-dense (1, C_out, T)


# ----------------------------------------------------------------------------
# Wrapper helpers
# ----------------------------------------------------------------------------
def _vmem_limit_bytes():
    """Generation-aware scoped-VMEM limit (v7x has 64 MiB physical, others 128)."""
    try:
        phys = int(pltpu.get_tpu_info().vmem_capacity_bytes)
    except Exception:
        phys = 64 * 1024 * 1024                           # conservative fallback
    return min(phys * 3 // 4, 100 * 1024 * 1024)


def _choose_tile(L, C_in, C_out, K, tile_budget_bytes):
    """Largest lane-dense (multiple-of-128) L-tile fitting the VMEM budget."""
    l128 = ((L + 127) // 128) * 128
    # Steady-state bytes per sequence column:
    #   bf16 x tile (double-buffered) + f32 out tile (double-buffered)
    #   + bf16 window/stacked intermediates + f32 conv accumulation.
    per_col = (2 * 2 * C_in) + (2 * 4 * C_out) + 2 * (K + 1) * C_in + 4 * C_out
    t_max = max(128, (tile_budget_bytes // per_col) // 128 * 128)
    T = min(t_max, l128, 2048)
    L_pad = ((L + T - 1) // T) * T
    return T, L_pad


# ----------------------------------------------------------------------------
# Forward
# ----------------------------------------------------------------------------
def conv_block_forward(x, weight, bias, gamma, beta, *, kernel_size, eps=1e-3,
                       fused_taps=None):
    """ConvBlock forward.

    x: (N, C_in, L); weight: (C_out, C_in, K); bias/gamma/beta: (C_out,).
    Output: (N, C_out, L) f32.

    Conv1d bias is a mathematical no-op under train-mode BatchNorm (cancels in
    (y - mean), variance unchanged) and is therefore not applied.
    """
    del bias
    N, C_in, L = x.shape
    C_out = weight.shape[0]
    K = kernel_size
    if fused_taps is None:
        fused_taps = C_in < 128                           # fused path for small C_in

    vmem_limit = _vmem_limit_bytes()
    T, L_pad = _choose_tile(L, C_in, C_out, K, vmem_limit // 2)
    num_l = L_pad // T
    grid = (N, num_l)

    # bf16 input stream (halves dominant HBM traffic; MXU consumes bf16 anyway).
    xb = x.astype(jnp.bfloat16)
    if L_pad != L:
        xb = jnp.pad(xb, ((0, 0), (0, 0), (0, L_pad - L)))

    w_f32 = jnp.transpose(weight, (0, 2, 1)).astype(jnp.float32)  # (C_out, K, C_in)
    if fused_taps:
        w_raw = w_f32.reshape(C_out, K * C_in).astype(jnp.bfloat16)
        w_spec = pl.BlockSpec((C_out, K * C_in), lambda n, l: (0, 0))
    else:
        w_raw = jnp.transpose(w_f32, (1, 0, 2)).astype(jnp.bfloat16)  # (K, C_out, C_in)
        w_spec = pl.BlockSpec((K, C_out, C_in), lambda n, l: (0, 0, 0))

    cparams = pltpu.CompilerParams(
        dimension_semantics=("parallel", "arbitrary"),    # batch // megacore, L sequential
        vmem_limit_bytes=vmem_limit,
    )

    conv_flops = 2 * N * L_pad * C_out * K * C_in
    x_bytes = xb.size * 2
    w_bytes = w_raw.size * 2

    x_spec = pl.BlockSpec((1, C_in, T), lambda n, l: (n, 0, l))
    carry_scratch = pltpu.VMEM((C_in, max(K - 1, 1)), jnp.bfloat16)

    # ---- Pass 1: per-channel batch statistics of the conv output -----------
    stats = pl.pallas_call(
        functools.partial(_stats_kernel, K=K, T=T, fused=fused_taps, L_valid=L),
        out_shape=jax.ShapeDtypeStruct((N, C_out, 2), jnp.float32),
        grid_spec=pltpu.PrefetchScalarGridSpec(
            num_scalar_prefetch=0,
            grid=grid,
            in_specs=[x_spec, w_spec],
            out_specs=pl.BlockSpec((1, C_out, 2), lambda n, l: (n, 0, 0)),
            scratch_shapes=[carry_scratch,
                            pltpu.VMEM((C_out, 2), jnp.float32)],
        ),
        compiler_params=cparams,
        cost_estimate=pl.CostEstimate(
            flops=conv_flops, transcendentals=0,
            bytes_accessed=x_bytes + w_bytes + N * C_out * 2 * 4),
    )(xb, w_raw)

    # ---- Fold BN into per-channel scale/shift; fold scale into weights -----
    tot = jnp.sum(stats, axis=0)                          # (C_out, 2)
    count = jnp.float32(N * L)
    mean = tot[:, 0] / count
    var = jnp.maximum(tot[:, 1] / count - mean * mean, 0.0)
    scale = gamma.astype(jnp.float32) * jax.lax.rsqrt(var + jnp.float32(eps))
    shift = (beta.astype(jnp.float32) - mean * scale).reshape(C_out, 1)

    if fused_taps:
        w_scaled = (w_f32.reshape(C_out, K * C_in) * scale[:, None]).astype(jnp.bfloat16)
    else:
        w_scaled = (jnp.transpose(w_f32, (1, 0, 2))
                    * scale[None, :, None]).astype(jnp.bfloat16)

    # ---- Pass 2: conv recompute + shift + ReLU, lane-dense store -----------
    out_pad = pl.pallas_call(
        functools.partial(_norm_kernel, K=K, T=T, fused=fused_taps),
        out_shape=jax.ShapeDtypeStruct((N, C_out, L_pad), jnp.float32),
        grid_spec=pltpu.PrefetchScalarGridSpec(
            num_scalar_prefetch=0,
            grid=grid,
            in_specs=[x_spec, w_spec,
                      pl.BlockSpec((C_out, 1), lambda n, l: (0, 0))],
            out_specs=pl.BlockSpec((1, C_out, T), lambda n, l: (n, 0, l)),
            scratch_shapes=[carry_scratch],
        ),
        compiler_params=cparams,
        cost_estimate=pl.CostEstimate(
            flops=conv_flops + 2 * N * C_out * L_pad, transcendentals=0,
            bytes_accessed=x_bytes + w_bytes + N * C_out * L_pad * 4),
    )(xb, w_scaled, shift)

    if L_pad != L:
        return out_pad[:, :, :L]
    return out_pad


# ----------------------------------------------------------------------------
# Pure-JAX reference (module semantics, full f32)
# ----------------------------------------------------------------------------
def _reference_forward(x, weight, bias, gamma, beta, *, kernel_size, eps=1e-3):
    K = kernel_size
    N, C_in, L = x.shape
    C_out = weight.shape[0]
    x_pad = jnp.pad(x, ((0, 0), (0, 0), (K - 1, 0)))
    y = jnp.zeros((N, C_out, L), jnp.float32)
    for k in range(K):
        y = y + jnp.einsum("oc,ncl->nol", weight[:, :, k], x_pad[:, :, k:k + L])
    y = y + bias[None, :, None]
    mean = jnp.mean(y, axis=(0, 2), keepdims=True)
    var = jnp.mean((y - mean) ** 2, axis=(0, 2), keepdims=True)
    y = (y - mean) / jnp.sqrt(var + eps)
    y = y * gamma[None, :, None] + beta[None, :, None]
    return jnp.maximum(y, 0.0)


if __name__ == "__main__":
    N, C_in, C_out, K = 2, 4, 8, 3
    EPS = 0.001  # ConvBlock default epsilon

    key = jax.random.PRNGKey(0)
    kx, kw, kb = jax.random.split(key, 3)

    bound = 1.0 / math.sqrt(C_in * K)
    weight = jax.random.uniform(kw, (C_out, C_in, K), jnp.float32, -bound, bound)
    bias = jax.random.uniform(kb, (C_out,), jnp.float32, -bound, bound)
    gamma = jnp.ones((C_out,), jnp.float32)   # BatchNorm default weight
    beta = jnp.zeros((C_out,), jnp.float32)   # BatchNorm default bias

    configs = [
        dict(L=256, fused_taps=None),    # lane-dense multi-of-128, fused-tap MXU path
        dict(L=256, fused_taps=False),   # per-tap accumulation path
        dict(L=200, fused_taps=None),    # remainder path: pad + masked stats
    ]
    for cfg in configs:
        L = cfg["L"]
        x = jax.random.normal(kx, (N, C_in, L), dtype=jnp.float32)
        out = conv_block_forward(x, weight, bias, gamma, beta,
                                 kernel_size=K, eps=EPS,
                                 fused_taps=cfg["fused_taps"])
        out = jax.block_until_ready(out)
        ref = _reference_forward(x, weight, bias, gamma, beta,
                                 kernel_size=K, eps=EPS)
        assert out.shape == (N, C_out, L)
        max_err = float(jnp.max(jnp.abs(out - ref)))
        assert max_err < 5e-2, f"cfg={cfg} max abs err {max_err}"  # bf16 vs f32 ref

    print("KERNEL_OK")
</pallas_src>

<mosaic_0001>
module attributes {stable_mosaic.version = 11 : i64} {
  func.func @_stats_kernel(%arg0: i32, %arg1: i32, %arg2: memref<1x4x256xbf16, #tpu.memory_space<vmem>>, %arg3: memref<8x12xbf16, #tpu.memory_space<vmem>>, %arg4: memref<1x8x2xf32, #tpu.memory_space<vmem>>, %arg5: memref<4x2xbf16, #tpu.memory_space<vmem>>, %arg6: memref<8x2xf32, #tpu.memory_space<vmem>>) attributes {dimension_semantics = [#tpu.dimension_semantics<parallel>, #tpu.dimension_semantics<arbitrary>], iteration_bounds = array<i64: 2, 1>, scalar_prefetch = 0 : i64, scratch_operands = 2 : i64, tpu.core_type = #tpu.core_type<tc>, window_params = [{transform_indices = @transform_0, window_bounds = array<i64: 1, 4, 256>}, {pipeline_mode = #tpu.pipeline_mode<synchronous>, transform_indices = @transform_1, window_bounds = array<i64: 8, 12>}, {transform_indices = @transform_2, window_bounds = array<i64: 1, 8, 2>}]} {
    %c0 = arith.constant 0 : index
    %c0_0 = arith.constant 0 : index
    %c0_1 = arith.constant 0 : index
    %0 = vector.load %arg2[%c0, %c0_0, %c0_1] : memref<1x4x256xbf16, #tpu.memory_space<vmem>>, vector<1x4x256xbf16>
    %1 = vector.shape_cast %0 : vector<1x4x256xbf16> to vector<4x256xbf16>
    %c0_i32 = arith.constant 0 : i32
    %2 = arith.cmpi eq, %arg1, %c0_i32 : i32
    %3 = arith.extui %2 : i1 to i32
    %c0_i32_2 = arith.constant 0 : i32
    %4 = arith.cmpi ne, %3, %c0_i32_2 : i32
    scf.if %4 {
      %cst_19 = arith.constant 0.000000e+00 : bf16
      %30 = vector.broadcast %cst_19 : bf16 to vector<4x2xbf16>
      %c0_20 = arith.constant 0 : index
      %c0_21 = arith.constant 0 : index
      %31 = vector.load %arg5[%c0_20, %c0_21] : memref<4x2xbf16, #tpu.memory_space<vmem>>, vector<4x2xbf16>
      tpu.vector_store %arg5[%c0_20, %c0_21], %30 {strides = array<i32>} : memref<4x2xbf16, #tpu.memory_space<vmem>>, vector<4x2xbf16>,
    } else {
    }
    %c0_3 = arith.constant 0 : index
    %c0_4 = arith.constant 0 : index
    %5 = vector.load %arg5[%c0_3, %c0_4] : memref<4x2xbf16, #tpu.memory_space<vmem>>, vector<4x2xbf16>
    %6 = tpu.concatenate %5, %1 in 1 : vector<4x2xbf16>, vector<4x256xbf16> -> vector<4x258xbf16>
    %7 = vector.extract_strided_slice %1 {offsets = [0, 254], sizes = [4, 2], strides = [1, 1]} : vector<4x256xbf16> to vector<4x2xbf16>
    %c0_5 = arith.constant 0 : index
    %c0_6 = arith.constant 0 : index
    %8 = vector.load %arg5[%c0_5, %c0_6] : memref<4x2xbf16, #tpu.memory_space<vmem>>, vector<4x2xbf16>
    tpu.vector_store %arg5[%c0_5, %c0_6], %7 {strides = array<i32>} : memref<4x2xbf16, #tpu.memory_space<vmem>>, vector<4x2xbf16>,
    %9 = vector.extract_strided_slice %6 {offsets = [0, 0], sizes = [4, 256], strides = [1, 1]} : vector<4x258xbf16> to vector<4x256xbf16>
    %10 = vector.extract_strided_slice %6 {offsets = [0, 1], sizes = [4, 256], strides = [1, 1]} : vector<4x258xbf16> to vector<4x256xbf16>
    %11 = vector.extract_strided_slice %6 {offsets = [0, 2], sizes = [4, 256], strides = [1, 1]} : vector<4x258xbf16> to vector<4x256xbf16>
    %12 = tpu.concatenate %9, %10, %11 in 0 : vector<4x256xbf16>, vector<4x256xbf16>, vector<4x256xbf16> -> vector<12x256xbf16>
    %c0_7 = arith.constant 0 : index
    %c0_8 = arith.constant 0 : index
    %13 = vector.load %arg3[%c0_7, %c0_8] : memref<8x12xbf16, #tpu.memory_space<vmem>>, vector<8x12xbf16>
    %cst = arith.constant dense<0.000000e+00> : vector<8x256xf32>
    %14 = tpu.matmul %13, %12, %cst {dimension_numbers = #tpu.dot_dimension_numbers<[1], [0], [0], [1], [0, 0, 1, 1], [], []>} : vector<8x12xbf16>, vector<12x256xbf16>, vector<8x256xf32> -> vector<8x256xf32>
    %cst_9 = arith.constant dense<0.000000e+00> : vector<8xf32>
    %15 = vector.multi_reduction <add>, %14, %cst_9 [1] : vector<8x256xf32> to vector<8xf32>
    %16 = vector.shape_cast %15 : vector<8xf32> to vector<8x1xf32>
    %17 = arith.mulf %14, %14 : vector<8x256xf32>
    %cst_10 = arith.constant dense<0.000000e+00> : vector<8xf32>
    %18 = vector.multi_reduction <add>, %17, %cst_10 [1] : vector<8x256xf32> to vector<8xf32>
    %19 = vector.shape_cast %18 : vector<8xf32> to vector<8x1xf32>
    %20 = tpu.concatenate %16, %19 in 1 : vector<8x1xf32>, vector<8x1xf32> -> vector<8x2xf32>
    %c0_i32_11 = arith.constant 0 : i32
    %21 = arith.cmpi eq, %arg1, %c0_i32_11 : i32
    %22 = arith.extui %21 : i1 to i32
    %c0_i32_12 = arith.constant 0 : i32
    %23 = arith.cmpi ne, %22, %c0_i32_12 : i32
    scf.if %23 {
      %cst_19 = arith.constant 0.000000e+00 : f32
      %30 = vector.broadcast %cst_19 : f32 to vector<8x2xf32>
      %c0_20 = arith.constant 0 : index
      %c0_21 = arith.constant 0 : index
      %31 = vector.load %arg6[%c0_20, %c0_21] : memref<8x2xf32, #tpu.memory_space<vmem>>, vector<8x2xf32>
      tpu.vector_store %arg6[%c0_20, %c0_21], %30 {strides = array<i32>} : memref<8x2xf32, #tpu.memory_space<vmem>>, vector<8x2xf32>,
    } else {
    }
    %c0_13 = arith.constant 0 : index
    %c0_14 = arith.constant 0 : index
    %24 = vector.load %arg6[%c0_13, %c0_14] : memref<8x2xf32, #tpu.memory_space<vmem>>, vector<8x2xf32>
    %25 = arith.addf %24, %20 : vector<8x2xf32>
    %c0_15 = arith.constant 0 : index
    %c0_16 = arith.constant 0 : index
    %26 = vector.load %arg6[%c0_15, %c0_16] : memref<8x2xf32, #tpu.memory_space<vmem>>, vector<8x2xf32>
    tpu.vector_store %arg6[%c0_15, %c0_16], %25 {strides = array<i32>} : memref<8x2xf32, #tpu.memory_space<vmem>>, vector<8x2xf32>,
    %c0_i32_17 = arith.constant 0 : i32
    %27 = arith.cmpi eq, %arg1, %c0_i32_17 : i32
    %28 = arith.extui %27 : i1 to i32
    %c0_i32_18 = arith.constant 0 : i32
    %29 = arith.cmpi ne, %28, %c0_i32_18 : i32
    scf.if %29 {
      %c0_19 = arith.constant 0 : index
      %c0_20 = arith.constant 0 : index
      %30 = vector.load %arg6[%c0_19, %c0_20] : memref<8x2xf32, #tpu.memory_space<vmem>>, vector<8x2xf32>
      %31 = vector.shape_cast %30 : vector<8x2xf32> to vector<1x8x2xf32>
      %c0_21 = arith.constant 0 : index
      %c0_22 = arith.constant 0 : index
      %c0_23 = arith.constant 0 : index
      %32 = vector.load %arg4[%c0_21, %c0_22, %c0_23] : memref<1x8x2xf32, #tpu.memory_space<vmem>>, vector<1x8x2xf32>
      tpu.vector_store %arg4[%c0_21, %c0_22, %c0_23], %31 {strides = array<i32>} : memref<1x8x2xf32, #tpu.memory_space<vmem>>, vector<1x8x2xf32>,
    } else {
    }
    return
  }
  func.func @transform_0(%arg0: i32, %arg1: i32) -> (i32, i32, i32) {
    %c0_i32 = arith.constant 0 : i32
    %c0_i32_0 = arith.constant 0 : i32
    return %arg0, %c0_i32, %arg1 : i32, i32, i32
  }
  func.func @transform_1(%arg0: i32, %arg1: i32) -> (i32, i32) {
    %c0_i32 = arith.constant 0 : i32
    %c0_i32_0 = arith.constant 0 : i32
    %c0_i32_1 = arith.constant 0 : i32
    return %c0_i32, %c0_i32_0 : i32, i32
  }
  func.func @transform_2(%arg0: i32, %arg1: i32) -> (i32, i32, i32) {
    %c0_i32 = arith.constant 0 : i32
    %c0_i32_0 = arith.constant 0 : i32
    %c0_i32_1 = arith.constant 0 : i32
    return %arg0, %c0_i32, %c0_i32_0 : i32, i32, i32
  }
}

</mosaic_0001>

<bundles_post_ra>
// kernel: tpu_custom_call.1
= control target key start
LH: loop header
LB: loop body
LE: loop exit
PB: predicated region body
PF: predicated region fallthrough
CT: control target
= control target key end

     0   :  { %7 = vsyncpa [#allocation5], 0  ;;  %s818_s0 = inlined_call_operand.hbm [shape: bf16[2,4,256], index: 0, kind: input, shape index: {}]   ;;  %s819_s1 = inlined_call_operand.hbm [shape: bf16[8,12], index: 1, kind: input, shape index: {}]   ;;  %s820_s2 = inlined_call_operand.vmem [shape: f32[2,8,2], index: 2, kind: output, shape index: {}]  }
   0x1   :  { %9 = vsyncpa [#allocation5 + $0x1], 0 }
   0x2   :  { %10 = vsyncpa [#allocation7], 0  ;;  %s645_s9 = smov 0   ;;  %s647_s10 = smov 0  }
   0x3   :  { %s649_s11 = smov 0   ;;  %s651_s12 = smov 0  }
   0x4   :  { %s653_s13 = smov 0   ;;  %s655_s14 = smov 0  }
   0x5 LB: > { %s419_s15 = sadd.s32 4294967295, %s620_s14   ;;  %p50_p0 = scmp.ne.s32.totalorder %s604_s10, %s600_s9  ;;  %s620_s14 = sphi %s655_s14, %s16_s14   ;;  %s616_s13 = sphi %s653_s13, %s839_s13   ;;  %s612_s12 = sphi %s651_s12, %s838_s12   ;;  %s608_s11 = sphi %s649_s11, %s837_s11   ;;  %s604_s10 = sphi %s647_s10, %s836_s10   ;;  %s600_s9 = sphi %s645_s9, %s835_s9  }
   0x6   : > { %p675_p1 = scmp.eq.s32.totalorder %s419_s15, 0  ;;  %p421_p2 = scmp.ge.s32.totalorder %s620_s14, 1 }
   0x7   : > { %p108_p3 = scmp.lt.s32.totalorder %s620_s14, 3  ;;  %s622_s19 = smov [#allocation6]  }
   0x8   : > { %s825_s16 = scalar_select %p675_p1, 1, 0 }
   0x9   : > { %p683_p4 = por %p675_p1, %p50_p0  ;;  %p687_p5 = pnand %p421_p2, %p108_p3 }
   0xa   : > { %s121_s20 = sshll.u32 %s622_s19, 4  ;;  %s28_s22 = sadd.s32 1, %s616_s13  ;;  %s122_s20 = int_to_ptr.vmem [resolvable:$true] %s121_s20 }
   0xb   : > { %s826_s17 = scalar_select %p683_p4, 1, 0 }
   0xc   : > { %s827_s18 = scalar_select %p687_p5, 1, 0 }
   0xd   : > { %p442_p6 = pneg %p687_p5  ;;  %s37_s23 = sadd.s32 1, %s608_s11 }
   0xe   : > { %p701_p8 = scmp.ge.s32.totalorder %s28_s22, 2  ;;  %s508_s27 = scalar_lea.hbm %s819_s1, 64 }
   0xf   : > { %p695_p7 = pnand %p442_p6, %p675_p1  ;;  %p509_p9 = scmp.ne.s32.totalorder %s819_s1, %s508_s27 }
  0x10   : > { %s829_s24 = scalar_select %p701_p8, 1, 0 }
  0x11   : > { %p510_p10 = pneg %p695_p7  ;;  %p515_p13 = scmp.lt.u32.totalorder %s508_s27, %s819_s1 }
  0x13   : > { %p511_p11 = pnand %p510_p10, %p509_p9 }
  0x15   : > { %p512_p12 = pneg %p511_p11 }
  0x17   : > { %p517_p0 = pnand %p515_p13, %p512_p12 }
  0x19   : > { %520 = shalt.err (!%p517_p0)
}
  0x1a   : > { %s521_s4 = scalar_lea.vmem %s122_s20, 64  ;;  %p529_p1 = scmp.lt.s32.totalorder %s122_s20, %s122_s20 }
  0x1b   : > { %p522_p2 = scmp.ne.s32.totalorder %s122_s20, %s521_s4  ;;  %p530_p4 = scmp.lt.s32.totalorder %s521_s4, %s521_s4 }
  0x1d   : > { %p524_p3 = pnand %p522_p2, %p510_p10  ;;  %p531_p5 = por %p530_p4, %p529_p1 }
  0x1f   : > { %p525_p6 = pneg %p524_p3 }
  0x21   : > { %p532_p8 = pnand %p531_p5, %p525_p6 }
  0x23   : > { %535 = shalt.err (!%p532_p8)
}
  0x24   : > { %445 = dma.hbm_to_vmem [thread:$0]  (!%p695_p7), %s819_s1, 64, %s122_s20, [#allocation7]  }
  0x25   : > { %p830_p9 = scmp.ne.s32.totalorder %s829_s24, 0  ;;  %p44_p1 = scmp.ne.s32.totalorder %s608_s11, %s604_s10 }
  0x26   : > { %p45_p4 = scmp.eq.s32.totalorder %s620_s14, 0  ;;  %p451_p5 = scmp.lt.s32.totalorder %s620_s14, 2 }
  0x27   : > { %s841_s22 = smov (%p830_p9, %s28_s22), 0  ;;  %s132_s8 = sand.u32 1, %s608_s11  }
  0x28   : > { %s32_s7 = ssub.s32 %s616_s13, %s841_s22  ;;  %p46_p10 = por %p45_p4, %p44_p1 }
  0x29   : > { %p35_p8 = scmp.eq.s32.totalorder %s32_s7, 0  ;;  %s435_s9 = sshll.u32 %s616_s13, 6 }
  0x2a   : > { %s424_s19 = sshll.u32 %s132_s8, 2  ;;  %s741_s20 = scalar_lea.hbm %s818_s0, %s435_s9 }
  0x2b   : > { %s736_s15 = scalar_select %p35_p8, %s608_s11, %s37_s23  }
  0x2c   : > { %s136_s24 = scalar_lea.vmem [#allocation4], %s424_s19  ;;  %p743_p7 = pnand %p451_p5, %p46_p10 }
  0x2d   : > { %s146_s26 = sshll.u32 %s136_s24, 4  ;;  %s133_s23 = scalar_lea.sflag [#allocation5], %s132_s8  ;;  %s747_s26 = int_to_ptr.vmem [resolvable:$true] %s146_s26 }
  0x2e   : > { %s536_s28 = scalar_lea.hbm %s741_s20, 64  ;;  %p538_p12 = pneg %p743_p7 }
  0x2f   : > { %p537_p11 = scmp.ne.s32.totalorder %s741_s20, %s536_s28  ;;  %s541_s3 = scalar_lea.hbm %s818_s0, 128 }
  0x30   : > { %p542_p2 = scmp.lt.u32.totalorder %s741_s20, %s818_s0  ;;  %p543_p3 = scmp.lt.u32.totalorder %s541_s3, %s536_s28 }
  0x31   : > { %p539_p13 = pnand %p538_p12, %p537_p11  ;;  %p545_p9 = scmp.lt.u32.totalorder %s536_s28, %s741_s20 }
  0x32   : > { %p544_p6 = por %p543_p3, %p542_p2 }
  0x33   : > { %p540_p0 = pneg %p539_p13 }
  0x34   : > { %p546_p1 = por %p545_p9, %p544_p6 }
  0x36   : > { %p547_p4 = pnand %p546_p1, %p540_p0 }
  0x38   : > { %550 = shalt.err (!%p547_p4)
}
  0x39   : > { %s551_s6 = scalar_lea.vmem %s747_s26, 64  ;;  %s623_s7 = smov [#allocation4]  }
  0x3a   : > { %p552_p5 = scmp.ne.s32.totalorder %s747_s26, %s551_s6  ;;  %s556_s8 = sshll.u32 %s623_s7, 4  ;;  %s557_s8 = int_to_ptr.vmem [resolvable:$false] %s556_s8 }
  0x3b   : > { %s558_s9 = scalar_lea.vmem %s557_s8, 128  ;;  %p559_p11 = scmp.lt.s32.totalorder %s747_s26, %s557_s8 }
  0x3c   : > { %p554_p8 = pnand %p552_p5, %p538_p12  ;;  %p560_p13 = scmp.lt.s32.totalorder %s558_s9, %s551_s6 }
  0x3e   : > { %p555_p10 = pneg %p554_p8  ;;  %p561_p2 = por %p560_p13, %p559_p11 }
  0x40   : > { %p562_p3 = pnand %p561_p2, %p555_p10 }
  0x42   : > { %565 = shalt.err (!%p562_p3)
}
  0x43   : > { %449 = dma.hbm_to_vmem [thread:$0]  (!%p743_p7), %s741_s20, 64, %s747_s26, %s133_s23  }
  0x44   : > { %p832_p0 = scmp.ne.s32.totalorder %s827_s18, 0 }
  0x45   : > { %s157_s19 = sand.u32 (!%p832_p0), 1, %s604_s10   ;;  %p833_p12 = scmp.ne.s32.totalorder (!%p832_p0), %s826_s17, 0 }
  0x46   : > { %155 = sbr.rel (%p832_p0) target bundleno = 712 (0x2c8), region = 28  ;;  %s428_s21 = sshll.u32 (!%p832_p0), %s157_s19, 2 }
  0x47   : > { %s158_s25 = scalar_lea.sflag (!%p832_p0), [#allocation5], %s157_s19  ;;  %s161_s24 = scalar_lea.vmem (!%p832_p0), [#allocation4], %s428_s21 }
  0x4d   : > { %591 = dma.done.wait (%p833_p12), %s158_s25, 64  }
  0x4e   : > { %593 = vsyncadd (%p833_p12), %s158_s25, 4294967232  ;;  %p834_p6 = scmp.ne.s32.totalorder %s825_s16, 0 }
  0x50   : > { %595 = dma.done.wait (%p834_p6), [#allocation7], 64  }
  0x51   : > { %597 = vsyncadd (%p834_p6), [#allocation7], 4294967232  ;;  %vm196_vm0 = vcmask 9216   ;;  %v203_v0 = vlaneseq  ;;  %v624_v1 = vmov 0   ;;  %v625_v2 = vmov 1983009808  }
  0x52   : > { %197 = vst.msk [vmem:[#allocation2] sm:$0x3] %vm196_vm0, %v624_v1  ;;  %v201_v3 = vunpack.c.l.s4 %v625_v2  ;;  %vm212_vm1 = vcmask 15360   ;;  %302 = vmatprep.mubr.bf16.mxu0 %v624_v1  ;;  %v626_v5 = vmov 0.0   ;;  %v191_v8 = vld [vmem:[%s161_s24] sm:$0xf] }
  0x53   : > { %v204_v4 = vshrl.u32 %v203_v0, 7  ;;  %324 = vst.msk [vmem:[#allocation3] sm:$0xff] %vm212_vm1, %v626_v5  ;;  %s627_s17 = smov 2   ;;  %s628_s16 = smov 127   ;;  %vm234_vm2 = vcmask 1039360   ;;  %vm249_vm3 = vcmask 1041408  }
  0x54   : > { %v202_v6 = vunpack.c.0.s8 %v201_v3  ;;  %s629_s18 = smov 126   ;;  %vm246_vm4 = vcmask 1031168   ;;  %vm255_vm5 = vcmask 1043456   ;;  %vm265_vm6 = vcmask 1045504   ;;  %v260_v37 = vld [vmem:[#allocation6] sm:$0xf] }
  0x55   : > { %vm261_vm7 = vcmask 97280   ;;  %p186_p7 = scmp.lt.s32.totalorder %s612_s12, 1  ;;  %vm319_vm8 = vcmask 7168  }
  0x56   : > { %v205_v7 = vsub.s32 %v202_v6, %v204_v4 }
  0x57   : > { %s843_s12 = smov (!%p186_p7, %s612_s12), 1 }
  0x58   : > { %v206_v9 = vrot.slane %v191_v8, %v205_v7  ;;  %s430_s20 = sshll.u32 %s843_s12, 3 }
  0x59   : > { %v198_v11 = vld [vmem:[#allocation2] sm:$0x3]  ;;  %s189_s23 = scalar_lea.vmem %s820_s2, %s430_s20 }
  0x5a   : > { %208 = vrot.lane.b32.xlu0 %v206_v9, %s627_s17  ;;  %v207_v10 = vcombine.high %v206_v9, %v206_v9  ;;  %v325_v47 = vld [vmem:[#allocation3] sm:$0xff] }
  0x5e   : > { %210 = vrot.lane.b32.xlu0 %v207_v10, %s627_s17 }
  0xcc   : > { %v209_v12 = vpop.permute.xlu0 %208 }
  0xcd   : > { %v217_v13 = vsel %vm212_vm1, %v198_v11, %v209_v12 }
  0xce   : > { %v225_v14 = vrot.slane %v217_v13, 6  ;;  %v237_v18 = vrot.slane %v217_v13, 4 }
  0xd0   : > { %228 = vrot.lane.b32.xlu1 %v225_v14, %s628_s16  ;;  %v211_v15 = vpop.permute.xlu0 %210 }
  0xd1   : > { %v227_v16 = vrot.slane %v211_v15, 6  ;;  %v213_v17 = vsel %vm212_vm1, %v209_v12, %v211_v15  ;;  %v239_v21 = vrot.slane %v211_v15, 4 }
  0xd2   : > { %v238_v19 = vrot.slane %v213_v17, 4  ;;  %v226_v20 = vrot.slane %v213_v17, 6 }
  0xd3   : > { %232 = vrot.lane.b32.xlu0 %v227_v16, %s628_s16 }
  0xd4   : > { %240 = vrot.lane.b32.xlu1 %v237_v18, %s629_s18 }
  0xd7   : > { %242 = vrot.lane.b32.xlu0 %v238_v19, %s629_s18 }
  0xd8   : > { %230 = vrot.lane.b32.xlu1 %v226_v20, %s628_s16 }
  0xdc   : > { %244 = vrot.lane.b32.xlu1 %v239_v21, %s629_s18 }
 0x142   : > { %v229_v22 = vpop.permute.xlu1 %228 }
 0x145   : > { %v233_v23 = vpop.permute.xlu0 %232 }
 0x146   : > { %v241_v24 = vpop.permute.xlu1 %240 }
 0x149   : > { %v243_v25 = vpop.permute.xlu0 %242 }
 0x14a   : > { %v231_v26 = vpop.permute.xlu1 %230  ;;  %v247_v30 = vsel %vm246_vm4, %v241_v24, %v243_v25 }
 0x14b   : > { %v235_v27 = vsel %vm234_vm2, %v229_v22, %v231_v26  ;;  %v236_v28 = vsel %vm234_vm2, %v231_v26, %v233_v23 }
 0x14c   : > { %v251_v29 = vsel %vm249_vm3, %v217_v13, %v235_v27  ;;  %v254_v34 = vsel %vm249_vm3, %v213_v17, %v236_v28 }
 0x14d   : > { %v257_v32 = vsel %vm255_vm5, %v251_v29, %v247_v30 }
 0x14e   : > { %v245_v31 = vpop.permute.xlu1 %244  ;;  %v266_v36 = vsel %vm265_vm6, %v257_v32, 0 }
 0x14f   : > { %v248_v33 = vsel %vm246_vm4, %v243_v25, %v245_v31 }
 0x150   : > { %v259_v35 = vsel %vm255_vm5, %v254_v34, %v248_v33 }
 0x151   : > { %431 = vmatprep.subr.msk.bf16.mxu0 %vm265_vm6, %v259_v35 }
 0x152   : > { %271 = vmatpush1.bf16.msra.mxu0 %v266_v36 }
 0x155   : > { %432 = vmatmul.mubr.msk.bf16.vlgmr.msra.gmra.mrb[0].mxu0 %vm261_vm7, %v260_v37 }
 0x228   : > { %v304_v38 = vpop.f32.mrb[0].mxu0 }
 0x229   : > { %v314_v39 = vmul.f32 %v304_v38, %v304_v38  ;;  %v306_v40 = vpop.f32.mrb[1].mxu0 }
 0x22a   : > { %v315_v41 = vmul.f32 %v306_v40, %v306_v40  ;;  %v308_v42 = vpop.f32.mrb[2].mxu0  ;;  %v311_v43 = vadd.f32 %v306_v40, %v304_v38 }
 0x22b   : > { %v309_v44 = vpop.f32.mrb[3].mxu0 }
 0x22c   : > { %312 = vadd.xlane.f32.xlu0 %v311_v43  ;;  %v316_v45 = vadd.f32 %v315_v41, %v314_v39 }
 0x22e   : > { %317 = vadd.xlane.f32.xlu1 %v316_v45 }
 0x242   : > { %218 = vrot.lane.b32.xlu0 %v191_v8, %s627_s17 }
 0x2b9   : > { %v313_v46 = vpop.xlane.xlu0 %312 }
 0x2bb   : > { %v318_v48 = vpop.xlane.xlu1 %317 }
 0x2bc   : > { %v320_v49 = vsel %vm319_vm8, %v313_v46, %v318_v48 }
 0x2bd   : > { %v326_v50 = vadd.f32 %v325_v47, %v320_v49  ;;  %v219_v51 = vpop.permute.xlu0 %218 }
 0x2be   : > { %v220_v52 = vrot.slane %v219_v51, 2 }
 0x2bf   : > { %327 = vst.msk [vmem:[#allocation3] sm:$0xff] %vm212_vm1, %v326_v50 }
 0x2c0   : > { %223 = vst.msk [vmem:[#allocation2] sm:$0x3] %vm196_vm0, %v220_v52 }
 0x2c6   : > { %v331_v53 = vld [vmem:[#allocation3] sm:$0xff] }
 0x2c7   : > { %332 = vst.msk [vmem:[%s189_s23] sm:$0xff] %vm212_vm1, %v331_v53 }
 0x2c8 PF: > { %s16_s14 = sadd.s32 1, %s620_s14   ;;  %s835_s9 = smov %s604_s10 }
 0x2c9   : > { %p13_p9 = scmp.ge.s32.totalorder %s16_s14, 4   ;;  %s836_s10 = smov %s608_s11 }
 0x2ca   : > { %s837_s11 = smov %s736_s15  ;;  %s838_s12 = smov %s616_s13 }
 0x2cb   : > { %s839_s13 = smov %s841_s22  ;;  %15 = sbr.rel (!%p13_p9) target bundleno = 5 (0x5), region = 84 }
 0x2d2   :  { %352 = vsyncpa [#allocation5], 1 }
 0x2d3   :  { %354 = vsyncpa [#allocation5 + $0x1], 1 }
 0x2d4   :  { %355 = vsyncpa [#allocation7], 1 }

</bundles_post_ra>
